<compile_context>
chip_gen: v6e
topology: v6e:2x2x1
jax: 0.10.0
libtpu: 0.0.40
codegen_flags: <defaults>
</compile_context>

<pallas_src>
import functools
import math

import jax
import jax.numpy as jnp
from jax.experimental import pallas as pl
from jax.experimental.pallas import tpu as pltpu


def _ordinal_loss_kernel(pred_ref, tgt_ref, e_ref, kvec_ref, wvec_ref,
                         out_ref, acc_ref, *, tr, num_rows, tiles_per_core, inv_bk):
    c = pl.program_id(0)   # reduction split (one half per TensorCore on megacore parts)
    i = pl.program_id(1)   # row-tile index within this split

    @pl.when(i == 0)
    def _init():
        acc_ref[...] = jnp.zeros_like(acc_ref)

    x = pred_ref[...].astype(jnp.float32)     # (tr, L) packed logits, cast in-register
    t = tgt_ref[...].astype(jnp.float32)      # (tr, R) integer class labels

    # Expand each label across its K packed lanes using the (otherwise idle) MXU:
    #   texp[r, j*K + k] = t[r, j]
    texp = jnp.dot(t, e_ref[...], preferred_element_type=jnp.float32)   # (tr, L)
    z = kvec_ref[...] < texp                  # ordinal target indicator (bool mask)

    # Numerically stable BCE-with-logits; target folded in as a select.
    loss = (jnp.maximum(x, 0.0) - jnp.where(z, x, 0.0)
            + jnp.log(1.0 + jnp.exp(-jnp.abs(x))))

    row0 = (c * tiles_per_core + i) * tr      # first global row covered by this tile

    @pl.when(row0 + tr <= num_rows)           # full tile: unmasked accumulate
    def _full():
        acc_ref[...] += jnp.sum(loss, axis=0, keepdims=True)

    @pl.when(row0 + tr > num_rows)            # straddling / out-of-range tile only
    def _partial():
        rows = row0 + jax.lax.broadcasted_iota(jnp.int32, loss.shape, 0)
        acc_ref[...] += jnp.sum(jnp.where(rows < num_rows, loss, 0.0),
                                axis=0, keepdims=True)

    @pl.when(i == tiles_per_core - 1)
    def _finalize():
        # Per-threshold weights + 1/(B*K) applied once, outside the hot loop.
        out_ref[...] = acc_ref[...] * wvec_ref[...] * jnp.float32(inv_bk)


def ordinal_regression_loss(predictions, targets, weights=None, *, tr=None):
    """predictions (B, K) float logits, targets (B,) int labels, weights (K,) -> scalar f32.

    Matches OrdinalRegressionLoss.forward:
      mean_{b,k}( BCEWithLogits(predictions[b,k], [k < targets[b]]) * weights[k] ).
    """
    B, K = predictions.shape
    if weights is None:
        weights = jnp.ones((K,), jnp.float32)

    # Packed lane-dense layout with no transpose: row-major (B, K) is flattened
    # (contiguous reshape = bitcast, no HBM relayout) into rows of L lanes.
    L = 128 * K // math.gcd(K, 128)          # lcm(K, 128): lane width, multiple of 128
    R = L // K                               # batch items folded into each row

    # Pad the batch only when ragged w.r.t. R. Padded logits (-inf) and labels (0)
    # contribute exactly zero loss, so they never need masking.
    b_pad = pl.cdiv(B, R) * R
    if b_pad != B:
        predictions = jnp.pad(predictions, ((0, b_pad - B), (0, 0)),
                              constant_values=-jnp.inf)
        targets = jnp.pad(targets, ((0, b_pad - B),))
    num_rows = b_pad // R
    pred2d = predictions.reshape(num_rows, L)   # free reshape (same row-major memory)
    tgt2d = targets.reshape(num_rows, R)

    # Tiny resident constants (fetched once, constant index_map).
    lane = jnp.arange(L, dtype=jnp.int32)
    e = (lane[None, :] // K == jnp.arange(R, dtype=jnp.int32)[:, None]).astype(jnp.float32)
    kvec = (lane % K).astype(jnp.float32)[None, :]             # threshold index per lane
    wvec = jnp.tile(weights.astype(jnp.float32), R)[None, :]   # weight per lane

    # Big row tiles (~256K elements) amortize the ~0.35us per-grid-step overhead;
    # per-tile VMEM stays tiny even double-buffered (fits all of v5e/v6e/v7x).
    if tr is None:
        tr = max(8, min((262144 // L) // 8 * 8, pl.cdiv(num_rows, 8) * 8))
    assert tr % 8 == 0
    nt = pl.cdiv(num_rows, tr)               # number of row tiles
    n_par = 2 if nt >= 2 else 1              # two-way reduction split ("parallel" axis):
                                             # one half per TensorCore on v7x megacore,
                                             # harmless serial split on v5e/v6e.
    tiles_per_core = pl.cdiv(nt, n_par)

    def row_block(c, i):
        # Clamp so a trailing out-of-range tile (odd tile count) still maps to a
        # legal block; its rows are masked away inside the kernel.
        return (jnp.minimum(c * tiles_per_core + i, nt - 1), 0)

    kernel = functools.partial(_ordinal_loss_kernel, tr=tr, num_rows=num_rows,
                               tiles_per_core=tiles_per_core, inv_bk=1.0 / (B * K))

    itemsize = jnp.dtype(predictions.dtype).itemsize
    out = pl.pallas_call(
        kernel,
        out_shape=jax.ShapeDtypeStruct((1, n_par * L), jnp.float32),
        grid_spec=pltpu.PrefetchScalarGridSpec(
            num_scalar_prefetch=0,
            grid=(n_par, tiles_per_core),
            in_specs=[
                pl.BlockSpec((tr, L), row_block),             # packed logits (lane-dense)
                pl.BlockSpec((tr, R), row_block),             # raw labels (one per item)
                pl.BlockSpec((R, L), lambda c, i: (0, 0)),    # lane-expansion matrix
                pl.BlockSpec((1, L), lambda c, i: (0, 0)),    # per-lane threshold index
                pl.BlockSpec((1, L), lambda c, i: (0, 0)),    # per-lane weights
            ],
            out_specs=pl.BlockSpec((1, L), lambda c, i: (0, c)),
            scratch_shapes=[pltpu.VMEM((1, L), jnp.float32)],
        ),
        compiler_params=pltpu.CompilerParams(
            dimension_semantics=("parallel", "arbitrary"),
        ),
        cost_estimate=pl.CostEstimate(
            flops=int(8 * B * K + 2 * B * L),
            transcendentals=int(2 * B * K),
            bytes_accessed=int(B * K * itemsize + B * 4 + (R + 2) * L * 4 + n_par * L * 4),
        ),
    )(pred2d, tgt2d, e, kvec, wvec)

    # TODO(synk): if the producer can emit int8/int16 labels, pass them through here
    # unchanged to cut label HBM traffic further (the kernel widens in-register).
    return jnp.sum(out)


def _reference(predictions, targets, weights):
    B, K = predictions.shape
    x = predictions.astype(jnp.float32)
    z = (jnp.arange(K)[None, :] < targets[:, None]).astype(jnp.float32)
    loss = jnp.maximum(x, 0.0) - x * z + jnp.log(1.0 + jnp.exp(-jnp.abs(x)))
    return jnp.mean(loss * weights[None, :].astype(jnp.float32))


if __name__ == "__main__":
    num_classes = 5
    K = num_classes - 1
    key = jax.random.PRNGKey(0)
    k1, k2, k3, k4, k5, k6 = jax.random.split(key, 6)

    loss_fn = jax.jit(ordinal_regression_loss, static_argnames=("tr",))

    # Small case (module-typical shapes): single tile, batch padded up to the
    # packing factor with zero-loss (-inf) logits.
    B = 8
    weights = jnp.ones((K,), jnp.float32)
    preds = jax.random.normal(k1, (B, K), jnp.float32)
    tgts = jax.random.randint(k2, (B,), 0, num_classes, dtype=jnp.int32)
    loss = jax.block_until_ready(loss_fn(preds, tgts, weights))
    ref = _reference(preds, tgts, weights)
    assert jnp.allclose(loss, ref, atol=1e-5, rtol=1e-5), (loss, ref)

    # Ragged multi-tile bf16 case: exercises grid accumulation, the two-way
    # reduction split, the straddling-row mask, and in-kernel dtype cast.
    B2 = 900
    preds2 = jax.random.normal(k3, (B2, K), jnp.float32).astype(jnp.bfloat16)
    tgts2 = jax.random.randint(k4, (B2,), 0, num_classes, dtype=jnp.int32)
    loss2 = jax.block_until_ready(loss_fn(preds2, tgts2, weights, tr=8))
    ref2 = _reference(preds2, tgts2, weights)
    assert jnp.allclose(loss2, ref2, atol=1e-5, rtol=1e-4), (loss2, ref2)

    # Odd tile-count case with non-trivial weights: exercises the clamped,
    # fully-masked trailing tile of the second reduction half.
    B3 = 700
    w3 = jax.random.uniform(k5, (K,), jnp.float32)
    preds3 = jax.random.normal(k6, (B3, K), jnp.float32)
    tgts3 = jax.random.randint(k2, (B3,), 0, num_classes, dtype=jnp.int32)
    loss3 = jax.block_until_ready(loss_fn(preds3, tgts3, w3, tr=8))
    ref3 = _reference(preds3, tgts3, w3)
    assert jnp.allclose(loss3, ref3, atol=1e-5, rtol=1e-4), (loss3, ref3)

    print("KERNEL_OK")
</pallas_src>

<mosaic_0001>
module attributes {stable_mosaic.version = 11 : i64} {
  func.func @_ordinal_loss_kernel(%arg0: i32, %arg1: i32, %arg2: memref<8x128xf32, #tpu.memory_space<vmem>>, %arg3: memref<8x32xi32, #tpu.memory_space<vmem>>, %arg4: memref<32x128xf32, #tpu.memory_space<vmem>>, %arg5: memref<1x128xf32, #tpu.memory_space<vmem>>, %arg6: memref<1x128xf32, #tpu.memory_space<vmem>>, %arg7: memref<1x128xf32, #tpu.memory_space<vmem>>, %arg8: memref<1x128xf32, #tpu.memory_space<vmem>>) attributes {dimension_semantics = [#tpu.dimension_semantics<parallel>, #tpu.dimension_semantics<arbitrary>], iteration_bounds = array<i64: 1, 1>, scalar_prefetch = 0 : i64, scratch_operands = 1 : i64, tpu.core_type = #tpu.core_type<tc>, window_params = [{transform_indices = @transform_0, window_bounds = array<i64: 8, 128>}, {transform_indices = @transform_1, window_bounds = array<i64: 8, 32>}, {pipeline_mode = #tpu.pipeline_mode<synchronous>, transform_indices = @transform_2, window_bounds = array<i64: 32, 128>}, {pipeline_mode = #tpu.pipeline_mode<synchronous>, transform_indices = @transform_3, window_bounds = array<i64: 1, 128>}, {pipeline_mode = #tpu.pipeline_mode<synchronous>, transform_indices = @transform_4, window_bounds = array<i64: 1, 128>}, {transform_indices = @transform_5, window_bounds = array<i64: 1, 128>}]} {
    %c0_i32 = arith.constant 0 : i32
    %0 = arith.cmpi eq, %arg1, %c0_i32 : i32
    %1 = arith.extui %0 : i1 to i32
    %c0_i32_0 = arith.constant 0 : i32
    %2 = arith.cmpi ne, %1, %c0_i32_0 : i32
    scf.if %2 {
      %cst_20 = arith.constant 0.000000e+00 : f32
      %38 = vector.broadcast %cst_20 : f32 to vector<1x128xf32>
      %c0_21 = arith.constant 0 : index
      %c0_22 = arith.constant 0 : index
      %39 = vector.load %arg8[%c0_21, %c0_22] : memref<1x128xf32, #tpu.memory_space<vmem>>, vector<1x128xf32>
      tpu.vector_store %arg8[%c0_21, %c0_22], %38 {strides = array<i32>} : memref<1x128xf32, #tpu.memory_space<vmem>>, vector<1x128xf32>,
    } else {
    }
    %c0 = arith.constant 0 : index
    %c0_1 = arith.constant 0 : index
    %3 = vector.load %arg2[%c0, %c0_1] : memref<8x128xf32, #tpu.memory_space<vmem>>, vector<8x128xf32>
    %c0_2 = arith.constant 0 : index
    %c0_3 = arith.constant 0 : index
    %4 = vector.load %arg3[%c0_2, %c0_3] : memref<8x32xi32, #tpu.memory_space<vmem>>, vector<8x32xi32>
    %5 = arith.sitofp %4 : vector<8x32xi32> to vector<8x32xf32>
    %c0_4 = arith.constant 0 : index
    %c0_5 = arith.constant 0 : index
    %6 = vector.load %arg4[%c0_4, %c0_5] : memref<32x128xf32, #tpu.memory_space<vmem>>, vector<32x128xf32>
    %cst = arith.constant dense<0.000000e+00> : vector<8x128xf32>
    %7 = tpu.matmul %5, %6, %cst {dimension_numbers = #tpu.dot_dimension_numbers<[1], [0], [0], [1], [0, 0, 1, 1], [], []>} : vector<8x32xf32>, vector<32x128xf32>, vector<8x128xf32> -> vector<8x128xf32>
    %c0_6 = arith.constant 0 : index
    %c0_7 = arith.constant 0 : index
    %8 = vector.load %arg5[%c0_6, %c0_7] : memref<1x128xf32, #tpu.memory_space<vmem>>, vector<1x128xf32>
    %9 = vector.broadcast %8 : vector<1x128xf32> to vector<8x128xf32>
    %10 = arith.cmpf olt, %9, %7 : vector<8x128xf32>
    %cst_8 = arith.constant 0.000000e+00 : f32
    %11 = vector.broadcast %cst_8 : f32 to vector<8x128xf32>
    %12 = arith.maximumf %3, %11 : vector<8x128xf32>
    %cst_9 = arith.constant 0.000000e+00 : f32
    %13 = vector.broadcast %cst_9 : f32 to vector<8x128xf32>
    %14 = arith.select %10, %3, %13 : vector<8x128xi1>, vector<8x128xf32>
    %15 = arith.subf %12, %14 : vector<8x128xf32>
    %16 = math.absf %3 : vector<8x128xf32>
    %cst_10 = arith.constant 0.000000e+00 : f32
    %17 = vector.broadcast %cst_10 : f32 to vector<8x128xf32>
    %18 = arith.subf %17, %16 : vector<8x128xf32>
    %19 = math.exp %18 : vector<8x128xf32>
    %cst_11 = arith.constant 1.000000e+00 : f32
    %20 = vector.broadcast %cst_11 : f32 to vector<8x128xf32>
    %21 = arith.addf %20, %19 : vector<8x128xf32>
    %22 = math.log %21 : vector<8x128xf32>
    %23 = arith.addf %15, %22 : vector<8x128xf32>
    %c1_i32 = arith.constant 1 : i32
    %24 = arith.muli %arg0, %c1_i32 : i32
    %25 = arith.addi %24, %arg1 : i32
    %c8_i32 = arith.constant 8 : i32
    %26 = arith.muli %25, %c8_i32 : i32
    %c8_i32_12 = arith.constant 8 : i32
    %27 = arith.addi %26, %c8_i32_12 : i32
    %c1_i32_13 = arith.constant 1 : i32
    %28 = arith.cmpi sle, %27, %c1_i32_13 : i32
    %29 = arith.extui %28 : i1 to i32
    %c0_i32_14 = arith.constant 0 : i32
    %30 = arith.cmpi ne, %29, %c0_i32_14 : i32
    scf.if %30 {
      %c0_20 = arith.constant 0 : index
      %c0_21 = arith.constant 0 : index
      %38 = vector.load %arg8[%c0_20, %c0_21] : memref<1x128xf32, #tpu.memory_space<vmem>>, vector<1x128xf32>
      %cst_22 = arith.constant dense<0.000000e+00> : vector<128xf32>
      %39 = vector.multi_reduction <add>, %23, %cst_22 [0] : vector<8x128xf32> to vector<128xf32>
      %40 = vector.shape_cast %39 : vector<128xf32> to vector<1x128xf32>
      %41 = arith.addf %38, %40 : vector<1x128xf32>
      %c0_23 = arith.constant 0 : index
      %c0_24 = arith.constant 0 : index
      %42 = vector.load %arg8[%c0_23, %c0_24] : memref<1x128xf32, #tpu.memory_space<vmem>>, vector<1x128xf32>
      tpu.vector_store %arg8[%c0_23, %c0_24], %41 {strides = array<i32>} : memref<1x128xf32, #tpu.memory_space<vmem>>, vector<1x128xf32>,
    } else {
    }
    %c8_i32_15 = arith.constant 8 : i32
    %31 = arith.addi %26, %c8_i32_15 : i32
    %c1_i32_16 = arith.constant 1 : i32
    %32 = arith.cmpi sgt, %31, %c1_i32_16 : i32
    %33 = arith.extui %32 : i1 to i32
    %c0_i32_17 = arith.constant 0 : i32
    %34 = arith.cmpi ne, %33, %c0_i32_17 : i32
    scf.if %34 {
      %38 = tpu.iota {dimensions = array<i32: 0>} : vector<8x128xi32>
      %39 = vector.broadcast %26 : i32 to vector<8x128xi32>
      %40 = arith.addi %39, %38 : vector<8x128xi32>
      %c0_20 = arith.constant 0 : index
      %c0_21 = arith.constant 0 : index
      %41 = vector.load %arg8[%c0_20, %c0_21] : memref<1x128xf32, #tpu.memory_space<vmem>>, vector<1x128xf32>
      %c1_i32_22 = arith.constant 1 : i32
      %42 = vector.broadcast %c1_i32_22 : i32 to vector<8x128xi32>
      %43 = arith.cmpi slt, %40, %42 : vector<8x128xi32>
      %cst_23 = arith.constant 0.000000e+00 : f32
      %44 = vector.broadcast %cst_23 : f32 to vector<8x128xf32>
      %45 = arith.select %43, %23, %44 : vector<8x128xi1>, vector<8x128xf32>
      %cst_24 = arith.constant dense<0.000000e+00> : vector<128xf32>
      %46 = vector.multi_reduction <add>, %45, %cst_24 [0] : vector<8x128xf32> to vector<128xf32>
      %47 = vector.shape_cast %46 : vector<128xf32> to vector<1x128xf32>
      %48 = arith.addf %41, %47 : vector<1x128xf32>
      %c0_25 = arith.constant 0 : index
      %c0_26 = arith.constant 0 : index
      %49 = vector.load %arg8[%c0_25, %c0_26] : memref<1x128xf32, #tpu.memory_space<vmem>>, vector<1x128xf32>
      tpu.vector_store %arg8[%c0_25, %c0_26], %48 {strides = array<i32>} : memref<1x128xf32, #tpu.memory_space<vmem>>, vector<1x128xf32>,
    } else {
    }
    %c0_i32_18 = arith.constant 0 : i32
    %35 = arith.cmpi eq, %arg1, %c0_i32_18 : i32
    %36 = arith.extui %35 : i1 to i32
    %c0_i32_19 = arith.constant 0 : i32
    %37 = arith.cmpi ne, %36, %c0_i32_19 : i32
    scf.if %37 {
      %c0_20 = arith.constant 0 : index
      %c0_21 = arith.constant 0 : index
      %38 = vector.load %arg8[%c0_20, %c0_21] : memref<1x128xf32, #tpu.memory_space<vmem>>, vector<1x128xf32>
      %c0_22 = arith.constant 0 : index
      %c0_23 = arith.constant 0 : index
      %39 = vector.load %arg6[%c0_22, %c0_23] : memref<1x128xf32, #tpu.memory_space<vmem>>, vector<1x128xf32>
      %40 = arith.mulf %38, %39 : vector<1x128xf32>
      %cst_24 = arith.constant 3.125000e-02 : f32
      %41 = vector.broadcast %cst_24 : f32 to vector<1x128xf32>
      %42 = arith.mulf %40, %41 : vector<1x128xf32>
      %c0_25 = arith.constant 0 : index
      %c0_26 = arith.constant 0 : index
      %43 = vector.load %arg7[%c0_25, %c0_26] : memref<1x128xf32, #tpu.memory_space<vmem>>, vector<1x128xf32>
      tpu.vector_store %arg7[%c0_25, %c0_26], %42 {strides = array<i32>} : memref<1x128xf32, #tpu.memory_space<vmem>>, vector<1x128xf32>,
    } else {
    }
    return
  }
  func.func @transform_0(%arg0: i32, %arg1: i32) -> (i32, i32) {
    %c1_i32 = arith.constant 1 : i32
    %0 = arith.muli %arg0, %c1_i32 : i32
    %1 = arith.addi %0, %arg1 : i32
    %c0_i32 = arith.constant 0 : i32
    %2 = arith.minsi %1, %c0_i32 : i32
    %c0_i32_0 = arith.constant 0 : i32
    %c0_i32_1 = arith.constant 0 : i32
    return %2, %c0_i32_0 : i32, i32
  }
  func.func @transform_1(%arg0: i32, %arg1: i32) -> (i32, i32) {
    %c1_i32 = arith.constant 1 : i32
    %0 = arith.muli %arg0, %c1_i32 : i32
    %1 = arith.addi %0, %arg1 : i32
    %c0_i32 = arith.constant 0 : i32
    %2 = arith.minsi %1, %c0_i32 : i32
    %c0_i32_0 = arith.constant 0 : i32
    %c0_i32_1 = arith.constant 0 : i32
    return %2, %c0_i32_0 : i32, i32
  }
  func.func @transform_2(%arg0: i32, %arg1: i32) -> (i32, i32) {
    %c0_i32 = arith.constant 0 : i32
    %c0_i32_0 = arith.constant 0 : i32
    %c0_i32_1 = arith.constant 0 : i32
    return %c0_i32, %c0_i32_0 : i32, i32
  }
  func.func @transform_3(%arg0: i32, %arg1: i32) -> (i32, i32) {
    %c0_i32 = arith.constant 0 : i32
    %c0_i32_0 = arith.constant 0 : i32
    %c0_i32_1 = arith.constant 0 : i32
    return %c0_i32, %c0_i32_0 : i32, i32
  }
  func.func @transform_4(%arg0: i32, %arg1: i32) -> (i32, i32) {
    %c0_i32 = arith.constant 0 : i32
    %c0_i32_0 = arith.constant 0 : i32
    %c0_i32_1 = arith.constant 0 : i32
    return %c0_i32, %c0_i32_0 : i32, i32
  }
  func.func @transform_5(%arg0: i32, %arg1: i32) -> (i32, i32) {
    %c0_i32 = arith.constant 0 : i32
    %c0_i32_0 = arith.constant 0 : i32
    return %c0_i32, %arg0 : i32, i32
  }
}

</mosaic_0001>

<bundles_post_ra>
// kernel: tile.8
= control target key start
LH: loop header
LB: loop body
LE: loop exit
PB: predicated region body
PF: predicated region fallthrough
CT: control target
= control target key end

     0   :  { %s40_s0 = inlined_call_operand.vmem [shape: f32[4], index: 0, kind: input, shape index: {}]   ;;  %s41_s1 = inlined_call_operand.vmem [shape: f32[32,4], index: 1, kind: output, shape index: {}]  }
   0x1   :  { %v4_v0 = vld [vmem:[%s40_s0] ss:$0 sm:$0xff] }
   0x2   :  { %5 = vst [vmem:[%s41_s1] sm:$0xff] %v4_v0  ;;  %12 = vst [vmem:[%s41_s1 + $0x8] sm:$0xff] %v4_v0 }
   0x3   :  { %13 = vst [vmem:[%s41_s1 + $0x10] sm:$0xff] %v4_v0  ;;  %14 = vst [vmem:[%s41_s1 + $0x18] sm:$0xff] %v4_v0 }

// kernel: ordinal_regression_loss.1
= control target key start
LH: loop header
LB: loop body
LE: loop exit
PB: predicated region body
PF: predicated region fallthrough
CT: control target
= control target key end

     0   :  { %v280_v0 = vmov 0.0   ;;  %vm281_vm0 = vmmov 0   ;;  %vm110_vm1 = vcmask 261120   ;;  %v223_v13 = vlaneseq  ;;  %s339_s2 = inlined_call_operand.vmem [shape: f32[32,128], index: 2, kind: input, shape index: {}]   ;;  %s340_s1 = inlined_call_operand.vmem [shape: s32[1,32], index: 1, kind: input, shape index: {}]   ;;  %s341_s0 = inlined_call_operand.vmem [shape: f32[1,128], index: 0, kind: input, shape index: {}]   ;;  %s342_s3 = inlined_call_operand.vmem [shape: f32[1,128], index: 3, kind: input, shape index: {}]   ;;  %s343_s4 = inlined_call_operand.vmem [shape: f32[1,128], index: 4, kind: input, shape index: {}]   ;;  %s344_s5 = inlined_call_operand.vmem [shape: f32[1,128], index: 5, kind: output, shape index: {}]  }
   0x1   :  { %102 = vst [vmem:[#allocation2] sm:$0x1] %v280_v0  ;;  %263 = vmatprep.subr.mxu0 %v280_v0  ;;  %v109_v1 = vld [vmem:[%s339_s2 + $0x18] sm:$0xff]  ;;  %v108_v2 = vld [vmem:[%s339_s2 + $0x10] sm:$0xff]  ;;  %271 = vmatprep.mubr.msk.f32.mxu0 %vm281_vm0, %v280_v0  ;;  %v104_v3 = vld [vmem:[%s340_s1] sm:$0xff] }
   0x2   :  { %264 = vmatpush3.msra.mxu0 %v109_v1  ;;  %v107_v4 = vld [vmem:[%s339_s2 + $0x8] sm:$0xff]  ;;  %v106_v5 = vld [vmem:[%s339_s2] sm:$0xff]  ;;  %v105_v6 = vcvt.s32.f32 %v104_v3  ;;  %v224_v18 = vshrl.u32 %v223_v13, 7 }
   0x3   :  { %265 = vmatprep.subr.mxu0 %v280_v0  ;;  %v103_v7 = vld [vmem:[%s341_s0] sm:$0xff] }
   0x4   :  { %266 = vmatpush3.msra.mxu0 %v108_v2  ;;  %v195_v8 = vand.u32 2147483647, %v103_v7  ;;  %v257_v15 = vld [vmem:[%s342_s3] ss:$0 sm:$0xff]  ;;  %v192_v16 = vmax.f32 %v103_v7, 0.0  ;;  %vm228_vm3 = vcmp.lt.s32.totalorder %v224_v18, 1 }
   0x5   :  { %267 = vmatprep.subr.mxu0 %v280_v0  ;;  %v242_v33 = vld [vmem:[%s343_s4] sm:$0x1] }
   0x6   :  { %268 = vmatpush3.msra.mxu0 %v107_v4  ;;  %v196_v9 = vsub.f32 0.0, %v195_v8 }
   0x7   :  { %269 = vmatprep.subr.mxu0 %v280_v0 }
   0x8   :  { %270 = vmatpush3.msra.mxu0 %v106_v5  ;;  %v197_v10 = vmul.f32 1.442695, %v196_v9  ;;  %v227_v30 = vld [vmem:[#allocation2] sm:$0x1] }
   0x9   :  { %272 = vmatmul.mubr.msk.f32.vlgmr.msra.gmra.mxu0 %vm110_vm1, %v105_v6 }
   0xa   :  { %276 = vpow2.f32 %v197_v10 }
  0x17   :  { %v277_v11 = vpop.eup %276 }
  0x18   :  { %v199_v12 = vadd.f32 1.0, %v277_v11 }
  0x1a   :  { %278 = vlog2.f32 %v199_v12 }
  0x27   :  { %v279_v14 = vpop.eup %278 }
  0x28   :  { %v201_v19 = vmul.f32 0.6931472, %v279_v14 }
  0xc9   :  { %v180_v17 = vpop.f32.mrf.mxu0 }
  0xca   :  { %vm191_vm2 = vcmp.lt.f32.partialorder %v257_v15, %v180_v17 }
  0xcb   :  { %v193_v20 = vsel %vm191_vm2, %v103_v7, 0.0  ;;  %v273_v21 = vpop.f32.mrf.mxu0 }
  0xcc   :  { %v194_v22 = vsub.f32 %v192_v16, %v193_v20 }
  0xce   :  { %v202_v23 = vadd.f32 %v201_v19, %v194_v22 }
  0xd0   :  { %v229_v24 = vsel %vm228_vm3, %v202_v23, 0.0 }
  0xd1   :  { %v230_v25 = vrot.slane %v229_v24, 4 }
  0xd3   :  { %v231_v26 = vadd.f32 %v230_v25, %v229_v24 }
  0xd5   :  { %v232_v27 = vrot.slane %v231_v26, 2 }
  0xd7   :  { %v233_v28 = vadd.f32 %v232_v27, %v231_v26 }
  0xd9   :  { %v234_v29 = vrot.slane %v233_v28, 1 }
  0xdb   :  { %v235_v31 = vadd.f32 %v234_v29, %v233_v28 }
  0xdd   :  { %v236_v32 = vadd.f32 %v235_v31, %v227_v30 }
  0xdf   :  { %237 = vst [vmem:[#allocation2] sm:$0x1] %v236_v32 }
  0xe6   :  { %v241_v34 = vld [vmem:[#allocation2] sm:$0x1] }
  0xe7   :  { %v243_v35 = vmul.f32 %v242_v33, %v241_v34 }
  0xe9   :  { %v244_v36 = vmul.f32 0.03125, %v243_v35 }
  0xeb   :  { %245 = vst [vmem:[%s344_s5] sm:$0x1] %v244_v36 }

</bundles_post_ra>
